<compile_context>
chip_gen: v7x
topology: tpu7x:2x2x1
jax: 0.10.0
libtpu: 0.0.40
codegen_flags: <defaults>
</compile_context>

<pallas_src>
import math

import jax
import jax.numpy as jnp
from jax.experimental import pallas as pl
from jax.experimental.pallas import tpu as pltpu

EPS = 1e-9                      # DiceLoss eps (matches the PyTorch module)
_LANE = 128
_MAX_TD = 8192                  # cap lane tile -> bounded unroll of the fold loop


def _cdiv(a: int, b: int) -> int:
    return -(-a // b)


def _round_up(a: int, b: int) -> int:
    return _cdiv(a, b) * b


def _vmem_limit_bytes() -> int:
    """Generation-aware scoped-VMEM limit (v5e/v6e: 128 MiB phys, v7x: 64 MiB)."""
    try:
        cap = int(pltpu.get_tpu_info().vmem_capacity_bytes)
    except Exception:
        cap = 128 * 1024 * 1024
    if cap >= 96 * 1024 * 1024:
        return 48 * 1024 * 1024     # v5e / v6e
    return 32 * 1024 * 1024         # v7x


def _bce_dice_kernel(logits_ref, targets_ref, bce_ref, inter_ref, union_ref):
    """One (rows, td) tile: accumulate lane-wide (rows, 128) partial sums."""
    k = pl.program_id(1)            # reduction step along the feature tiles

    @pl.when(k == 0)
    def _init():
        bce_ref[...] = jnp.zeros_like(bce_ref)
        inter_ref[...] = jnp.zeros_like(inter_ref)
        union_ref[...] = jnp.zeros_like(union_ref)

    x = logits_ref[...].astype(jnp.float32)
    t = targets_ref[...].astype(jnp.float32)

    # One EUP exp per element, shared by BCE and sigmoid.
    e = jnp.exp(-jnp.abs(x))                                  # exp(-|x|) in (0, 1]
    # Stable BCEWithLogits: max(x, 0) - x*t + log1p(exp(-|x|))
    bce_elem = jnp.maximum(x, 0.0) - x * t + jnp.log1p(e)
    # sigmoid via approximate EUP reciprocal + one Newton step (~f32 accuracy).
    den = 1.0 + e
    r = pl.reciprocal(den, approx=True)
    r = r * (2.0 - den * r)
    p = jnp.where(x >= 0.0, r, e * r)

    pt = p * t
    pu = p + t

    # Lane-wide accumulation: fold 128-lane chunks with pure VPU adds; the
    # single cross-lane reduce happens once in the JAX epilogue.
    nch = x.shape[1] // _LANE
    acc_b = bce_elem[:, 0:_LANE]
    acc_i = pt[:, 0:_LANE]
    acc_u = pu[:, 0:_LANE]
    for c in range(1, nch):
        s = slice(c * _LANE, (c + 1) * _LANE)
        acc_b = acc_b + bce_elem[:, s]
        acc_i = acc_i + pt[:, s]
        acc_u = acc_u + pu[:, s]

    bce_ref[...] += acc_b
    inter_ref[...] += acc_i
    union_ref[...] += acc_u


def _pick_lane_tile(dw: int, rows: int, itemsize: int, vmem_limit: int) -> int:
    """Largest 128-multiple lane tile fitting the VMEM budget (true itemsize)."""
    # Double-buffered input tiles (2 inputs x 2 buffers x itemsize) plus ~6 f32
    # temporaries materialised by the compiler per tile.
    per_elem = 4 * itemsize + 6 * 4
    budget = int(vmem_limit * 0.6)
    max_elems = max(rows * _LANE, budget // per_elem)
    td = (max_elems // rows) // _LANE * _LANE
    td = min(td, _MAX_TD, dw)
    return max(td, _LANE)


def bce_dice_loss(logits: jax.Array, targets: jax.Array) -> jax.Array:
    """BCEWithLogitsLoss(logits, targets) + DiceLoss(logits, targets)."""
    n = logits.shape[0]
    d = int(math.prod(logits.shape[1:]))

    # Sublane-dense layout for small batches: each sample's features split into
    # r rows so the 8 sublanes stay full even for N < 8.
    r = 1 if n >= 8 else _cdiv(8, n)
    rows = n * r
    # TODO(synk): add a row-tiling grid axis for very large N (the rows x 128
    # minimum block could otherwise exceed the VMEM limit).

    vmem_limit = _vmem_limit_bytes()
    itemsize = max(logits.dtype.itemsize, targets.dtype.itemsize)

    dw0 = _round_up(_cdiv(d, r), _LANE)              # per-row features, lane-aligned
    td = _pick_lane_tile(dw0, rows, itemsize, vmem_limit)
    total_tiles = _cdiv(dw0, td)
    p_shards = 2 if total_tiles >= 2 else 1          # megacore axis always usable
    total_tiles = _round_up(total_tiles, p_shards)
    td = _round_up(_cdiv(dw0, total_tiles), _LANE)   # rebalance -> minimal padding
    dw = td * total_tiles
    tiles_per_shard = total_tiles // p_shards

    # Pad flattened features per sample. Padded logits are a large finite
    # negative (never -inf: -inf * 0 -> NaN), padded targets are 0, so padded
    # elements contribute exactly 0 to BCE, intersection and union.
    d_pad = dw * r
    lg = logits.reshape(n, d)
    tg = targets.reshape(n, d)
    if d_pad > d:
        lg = jnp.pad(lg, ((0, 0), (0, d_pad - d)), constant_values=-1e4)
        tg = jnp.pad(tg, ((0, 0), (0, d_pad - d)), constant_values=0)
    lg = lg.reshape(rows, dw)
    tg = tg.reshape(rows, dw)

    in_map = lambda pi, k: (0, pi * tiles_per_shard + k)
    if td == _LANE and tiles_per_shard >= 3:
        # Short 128-lane DMAs: deepen the input pipeline to hide latency.
        in_spec = pl.BlockSpec((rows, td), in_map, pipeline_mode=pl.Buffered(3))
    else:
        in_spec = pl.BlockSpec((rows, td), in_map)
    out_spec = pl.BlockSpec((None, rows, _LANE), lambda pi, k: (pi, 0, 0))

    out_bytes = 3 * p_shards * rows * _LANE * 4
    cost = pl.CostEstimate(
        flops=12 * n * d,
        transcendentals=3 * n * d,        # exp + log1p + rcp per element
        bytes_accessed=int(lg.size * lg.dtype.itemsize
                           + tg.size * tg.dtype.itemsize + out_bytes),
    )

    bce_p, inter_p, union_p = pl.pallas_call(
        _bce_dice_kernel,
        out_shape=(
            jax.ShapeDtypeStruct((p_shards, rows, _LANE), jnp.float32),
            jax.ShapeDtypeStruct((p_shards, rows, _LANE), jnp.float32),
            jax.ShapeDtypeStruct((p_shards, rows, _LANE), jnp.float32),
        ),
        grid_spec=pltpu.PrefetchScalarGridSpec(
            num_scalar_prefetch=0,
            grid=(p_shards, tiles_per_shard),
            in_specs=[in_spec, in_spec],
            out_specs=[out_spec, out_spec, out_spec],
        ),
        compiler_params=pltpu.CompilerParams(
            dimension_semantics=("parallel", "arbitrary"),
            vmem_limit_bytes=vmem_limit,
        ),
        cost_estimate=cost,
    )(lg, tg)

    # Tiny final combine in plain JAX (single cross-lane reduce, once).
    bce = jnp.sum(bce_p) / float(n * d)
    inter = jnp.sum(inter_p.reshape(p_shards, n, r, _LANE), axis=(0, 2, 3))   # (n,)
    union = jnp.sum(union_p.reshape(p_shards, n, r, _LANE), axis=(0, 2, 3))   # (n,)
    dice_score = (2.0 * inter + EPS) / (union + EPS)
    return bce + (1.0 - jnp.mean(dice_score))


def _reference(logits, targets):
    """Pure-JAX reference matching the PyTorch module semantics."""
    x = logits.astype(jnp.float32)
    t = targets.astype(jnp.float32)
    bce = jnp.mean(jnp.maximum(x, 0.0) - x * t + jnp.log1p(jnp.exp(-jnp.abs(x))))
    n = x.shape[0]
    p = jax.nn.sigmoid(x).reshape(n, -1)
    tf = t.reshape(n, -1)
    inter = 2.0 * jnp.sum(p * tf, axis=1)
    union = jnp.sum(p, axis=1) + jnp.sum(tf, axis=1)
    dice = 1.0 - jnp.mean((inter + EPS) / (union + EPS))
    return bce + dice


if __name__ == "__main__":
    key = jax.random.PRNGKey(0)
    k1, k2 = jax.random.split(key)

    # NCHW: batch=2, channels=4, spatial=16x16  (D = 4*16*16 = 1024)
    logits = jax.random.normal(k1, (2, 4, 16, 16), dtype=jnp.float32)
    targets = (jax.random.uniform(k2, (2, 4, 16, 16)) < 0.5).astype(jnp.float32)

    loss = bce_dice_loss(logits, targets)
    jax.block_until_ready(loss)
    ref = _reference(logits, targets)
    assert jnp.allclose(loss, ref, rtol=1e-5, atol=1e-5), (loss, ref)

    # Narrow HBM dtypes (bandwidth-bound v5e/v6e): bf16 logits, int8 {0,1} targets.
    lg_bf16 = logits.astype(jnp.bfloat16)
    tg_i8 = targets.astype(jnp.int8)
    loss_nar = bce_dice_loss(lg_bf16, tg_i8)
    jax.block_until_ready(loss_nar)
    ref_nar = _reference(lg_bf16.astype(jnp.float32), tg_i8.astype(jnp.float32))
    assert jnp.allclose(loss_nar, ref_nar, rtol=1e-5, atol=1e-5), (loss_nar, ref_nar)

    # Odd feature count exercises the lane-padding path (D = 3*7*5 = 105).
    k3, k4 = jax.random.split(k1)
    lg_odd = jax.random.normal(k3, (2, 3, 7, 5), dtype=jnp.float32)
    tg_odd = (jax.random.uniform(k4, (2, 3, 7, 5)) < 0.5).astype(jnp.float32)
    loss_odd = bce_dice_loss(lg_odd, tg_odd)
    jax.block_until_ready(loss_odd)
    ref_odd = _reference(lg_odd, tg_odd)
    assert jnp.allclose(loss_odd, ref_odd, rtol=1e-5, atol=1e-5), (loss_odd, ref_odd)

    print("KERNEL_OK")
</pallas_src>

<mosaic_0001>
module attributes {stable_mosaic.version = 11 : i64} {
  func.func @_bce_dice_kernel(%arg0: i32, %arg1: i32, %arg2: memref<8x256xf32, #tpu.memory_space<vmem>>, %arg3: memref<8x256xf32, #tpu.memory_space<vmem>>, %arg4: memref<1x8x128xf32, #tpu.memory_space<vmem>>, %arg5: memref<1x8x128xf32, #tpu.memory_space<vmem>>, %arg6: memref<1x8x128xf32, #tpu.memory_space<vmem>>) attributes {dimension_semantics = [#tpu.dimension_semantics<parallel>, #tpu.dimension_semantics<arbitrary>], iteration_bounds = array<i64: 1, 1>, scalar_prefetch = 0 : i64, scratch_operands = 0 : i64, tpu.core_type = #tpu.core_type<tc>, window_params = [{transform_indices = @transform_0, window_bounds = array<i64: 8, 256>}, {transform_indices = @transform_1, window_bounds = array<i64: 8, 256>}, {transform_indices = @transform_2, window_bounds = array<i64: 1, 8, 128>}, {transform_indices = @transform_3, window_bounds = array<i64: 1, 8, 128>}, {transform_indices = @transform_4, window_bounds = array<i64: 1, 8, 128>}]} {
    %c0_i32 = arith.constant 0 : i32
    %0 = arith.cmpi eq, %arg1, %c0_i32 : i32
    %1 = arith.extui %0 : i1 to i32
    %c0_i32_0 = arith.constant 0 : i32
    %2 = arith.cmpi ne, %1, %c0_i32_0 : i32
    scf.if %2 {
      %cst_26 = arith.constant 0.000000e+00 : f32
      %55 = vector.broadcast %cst_26 : f32 to vector<8x128xf32>
      %c0_27 = arith.constant 0 : index
      %c0_28 = arith.constant 0 : index
      %c0_29 = arith.constant 0 : index
      %56 = vector.load %arg4[%c0_27, %c0_28, %c0_29] : memref<1x8x128xf32, #tpu.memory_space<vmem>>, vector<1x8x128xf32>
      %57 = vector.shape_cast %56 : vector<1x8x128xf32> to vector<8x128xf32>
      %58 = vector.shape_cast %55 : vector<8x128xf32> to vector<1x8x128xf32>
      tpu.vector_store %arg4[%c0_27, %c0_28, %c0_29], %58 {strides = array<i32>} : memref<1x8x128xf32, #tpu.memory_space<vmem>>, vector<1x8x128xf32>,
      %cst_30 = arith.constant 0.000000e+00 : f32
      %59 = vector.broadcast %cst_30 : f32 to vector<8x128xf32>
      %c0_31 = arith.constant 0 : index
      %c0_32 = arith.constant 0 : index
      %c0_33 = arith.constant 0 : index
      %60 = vector.load %arg5[%c0_31, %c0_32, %c0_33] : memref<1x8x128xf32, #tpu.memory_space<vmem>>, vector<1x8x128xf32>
      %61 = vector.shape_cast %60 : vector<1x8x128xf32> to vector<8x128xf32>
      %62 = vector.shape_cast %59 : vector<8x128xf32> to vector<1x8x128xf32>
      tpu.vector_store %arg5[%c0_31, %c0_32, %c0_33], %62 {strides = array<i32>} : memref<1x8x128xf32, #tpu.memory_space<vmem>>, vector<1x8x128xf32>,
      %cst_34 = arith.constant 0.000000e+00 : f32
      %63 = vector.broadcast %cst_34 : f32 to vector<8x128xf32>
      %c0_35 = arith.constant 0 : index
      %c0_36 = arith.constant 0 : index
      %c0_37 = arith.constant 0 : index
      %64 = vector.load %arg6[%c0_35, %c0_36, %c0_37] : memref<1x8x128xf32, #tpu.memory_space<vmem>>, vector<1x8x128xf32>
      %65 = vector.shape_cast %64 : vector<1x8x128xf32> to vector<8x128xf32>
      %66 = vector.shape_cast %63 : vector<8x128xf32> to vector<1x8x128xf32>
      tpu.vector_store %arg6[%c0_35, %c0_36, %c0_37], %66 {strides = array<i32>} : memref<1x8x128xf32, #tpu.memory_space<vmem>>, vector<1x8x128xf32>,
    } else {
    }
    %c0 = arith.constant 0 : index
    %c0_1 = arith.constant 0 : index
    %3 = vector.load %arg2[%c0, %c0_1] : memref<8x256xf32, #tpu.memory_space<vmem>>, vector<8x256xf32>
    %c0_2 = arith.constant 0 : index
    %c0_3 = arith.constant 0 : index
    %4 = vector.load %arg3[%c0_2, %c0_3] : memref<8x256xf32, #tpu.memory_space<vmem>>, vector<8x256xf32>
    %5 = math.absf %3 : vector<8x256xf32>
    %cst = arith.constant 0.000000e+00 : f32
    %6 = vector.broadcast %cst : f32 to vector<8x256xf32>
    %7 = arith.subf %6, %5 : vector<8x256xf32>
    %8 = math.exp %7 : vector<8x256xf32>
    %cst_4 = arith.constant 0.000000e+00 : f32
    %9 = vector.broadcast %cst_4 : f32 to vector<8x256xf32>
    %10 = arith.maximumf %3, %9 : vector<8x256xf32>
    %11 = arith.mulf %3, %4 : vector<8x256xf32>
    %12 = arith.subf %10, %11 : vector<8x256xf32>
    %13 = math.log1p %8 : vector<8x256xf32>
    %14 = arith.addf %12, %13 : vector<8x256xf32>
    %cst_5 = arith.constant 1.000000e+00 : f32
    %15 = vector.broadcast %cst_5 : f32 to vector<8x256xf32>
    %16 = arith.addf %15, %8 : vector<8x256xf32>
    %17 = tpu.reciprocal %16 {approx = true} : vector<8x256xf32> -> vector<8x256xf32>
    %18 = arith.mulf %16, %17 : vector<8x256xf32>
    %cst_6 = arith.constant 2.000000e+00 : f32
    %19 = vector.broadcast %cst_6 : f32 to vector<8x256xf32>
    %20 = arith.subf %19, %18 : vector<8x256xf32>
    %21 = arith.mulf %17, %20 : vector<8x256xf32>
    %cst_7 = arith.constant 0.000000e+00 : f32
    %22 = vector.broadcast %cst_7 : f32 to vector<8x256xf32>
    %23 = arith.cmpf oge, %3, %22 : vector<8x256xf32>
    %24 = arith.mulf %8, %21 : vector<8x256xf32>
    %25 = arith.select %23, %21, %24 : vector<8x256xi1>, vector<8x256xf32>
    %26 = arith.mulf %25, %4 : vector<8x256xf32>
    %27 = arith.addf %25, %4 : vector<8x256xf32>
    %28 = vector.extract_strided_slice %14 {offsets = [0, 0], sizes = [8, 128], strides = [1, 1]} : vector<8x256xf32> to vector<8x128xf32>
    %29 = vector.extract_strided_slice %26 {offsets = [0, 0], sizes = [8, 128], strides = [1, 1]} : vector<8x256xf32> to vector<8x128xf32>
    %30 = vector.extract_strided_slice %27 {offsets = [0, 0], sizes = [8, 128], strides = [1, 1]} : vector<8x256xf32> to vector<8x128xf32>
    %31 = vector.extract_strided_slice %14 {offsets = [0, 128], sizes = [8, 128], strides = [1, 1]} : vector<8x256xf32> to vector<8x128xf32>
    %32 = arith.addf %28, %31 : vector<8x128xf32>
    %33 = vector.extract_strided_slice %26 {offsets = [0, 128], sizes = [8, 128], strides = [1, 1]} : vector<8x256xf32> to vector<8x128xf32>
    %34 = arith.addf %29, %33 : vector<8x128xf32>
    %35 = vector.extract_strided_slice %27 {offsets = [0, 128], sizes = [8, 128], strides = [1, 1]} : vector<8x256xf32> to vector<8x128xf32>
    %36 = arith.addf %30, %35 : vector<8x128xf32>
    %c0_8 = arith.constant 0 : index
    %c0_9 = arith.constant 0 : index
    %c0_10 = arith.constant 0 : index
    %37 = vector.load %arg4[%c0_8, %c0_9, %c0_10] : memref<1x8x128xf32, #tpu.memory_space<vmem>>, vector<1x8x128xf32>
    %38 = vector.shape_cast %37 : vector<1x8x128xf32> to vector<8x128xf32>
    %39 = arith.addf %38, %32 : vector<8x128xf32>
    %c0_11 = arith.constant 0 : index
    %c0_12 = arith.constant 0 : index
    %c0_13 = arith.constant 0 : index
    %40 = vector.load %arg4[%c0_11, %c0_12, %c0_13] : memref<1x8x128xf32, #tpu.memory_space<vmem>>, vector<1x8x128xf32>
    %41 = vector.shape_cast %40 : vector<1x8x128xf32> to vector<8x128xf32>
    %42 = vector.shape_cast %39 : vector<8x128xf32> to vector<1x8x128xf32>
    tpu.vector_store %arg4[%c0_11, %c0_12, %c0_13], %42 {strides = array<i32>} : memref<1x8x128xf32, #tpu.memory_space<vmem>>, vector<1x8x128xf32>,
    %c0_14 = arith.constant 0 : index
    %c0_15 = arith.constant 0 : index
    %c0_16 = arith.constant 0 : index
    %43 = vector.load %arg5[%c0_14, %c0_15, %c0_16] : memref<1x8x128xf32, #tpu.memory_space<vmem>>, vector<1x8x128xf32>
    %44 = vector.shape_cast %43 : vector<1x8x128xf32> to vector<8x128xf32>
    %45 = arith.addf %44, %34 : vector<8x128xf32>
    %c0_17 = arith.constant 0 : index
    %c0_18 = arith.constant 0 : index
    %c0_19 = arith.constant 0 : index
    %46 = vector.load %arg5[%c0_17, %c0_18, %c0_19] : memref<1x8x128xf32, #tpu.memory_space<vmem>>, vector<1x8x128xf32>
    %47 = vector.shape_cast %46 : vector<1x8x128xf32> to vector<8x128xf32>
    %48 = vector.shape_cast %45 : vector<8x128xf32> to vector<1x8x128xf32>
    tpu.vector_store %arg5[%c0_17, %c0_18, %c0_19], %48 {strides = array<i32>} : memref<1x8x128xf32, #tpu.memory_space<vmem>>, vector<1x8x128xf32>,
    %c0_20 = arith.constant 0 : index
    %c0_21 = arith.constant 0 : index
    %c0_22 = arith.constant 0 : index
    %49 = vector.load %arg6[%c0_20, %c0_21, %c0_22] : memref<1x8x128xf32, #tpu.memory_space<vmem>>, vector<1x8x128xf32>
    %50 = vector.shape_cast %49 : vector<1x8x128xf32> to vector<8x128xf32>
    %51 = arith.addf %50, %36 : vector<8x128xf32>
    %c0_23 = arith.constant 0 : index
    %c0_24 = arith.constant 0 : index
    %c0_25 = arith.constant 0 : index
    %52 = vector.load %arg6[%c0_23, %c0_24, %c0_25] : memref<1x8x128xf32, #tpu.memory_space<vmem>>, vector<1x8x128xf32>
    %53 = vector.shape_cast %52 : vector<1x8x128xf32> to vector<8x128xf32>
    %54 = vector.shape_cast %51 : vector<8x128xf32> to vector<1x8x128xf32>
    tpu.vector_store %arg6[%c0_23, %c0_24, %c0_25], %54 {strides = array<i32>} : memref<1x8x128xf32, #tpu.memory_space<vmem>>, vector<1x8x128xf32>,
    return
  }
  func.func @transform_0(%arg0: i32, %arg1: i32) -> (i32, i32) {
    %c1_i32 = arith.constant 1 : i32
    %0 = arith.muli %arg0, %c1_i32 : i32
    %1 = arith.addi %0, %arg1 : i32
    %c0_i32 = arith.constant 0 : i32
    %c0_i32_0 = arith.constant 0 : i32
    return %c0_i32, %1 : i32, i32
  }
  func.func @transform_1(%arg0: i32, %arg1: i32) -> (i32, i32) {
    %c1_i32 = arith.constant 1 : i32
    %0 = arith.muli %arg0, %c1_i32 : i32
    %1 = arith.addi %0, %arg1 : i32
    %c0_i32 = arith.constant 0 : i32
    %c0_i32_0 = arith.constant 0 : i32
    return %c0_i32, %1 : i32, i32
  }
  func.func @transform_2(%arg0: i32, %arg1: i32) -> (i32, i32, i32) {
    %c0_i32 = arith.constant 0 : i32
    %c0_i32_0 = arith.constant 0 : i32
    %c0_i32_1 = arith.constant 0 : i32
    return %arg0, %c0_i32, %c0_i32_0 : i32, i32, i32
  }
  func.func @transform_3(%arg0: i32, %arg1: i32) -> (i32, i32, i32) {
    %c0_i32 = arith.constant 0 : i32
    %c0_i32_0 = arith.constant 0 : i32
    %c0_i32_1 = arith.constant 0 : i32
    return %arg0, %c0_i32, %c0_i32_0 : i32, i32, i32
  }
  func.func @transform_4(%arg0: i32, %arg1: i32) -> (i32, i32, i32) {
    %c0_i32 = arith.constant 0 : i32
    %c0_i32_0 = arith.constant 0 : i32
    %c0_i32_1 = arith.constant 0 : i32
    return %arg0, %c0_i32, %c0_i32_0 : i32, i32, i32
  }
}

</mosaic_0001>

<bundles_post_ra>
// kernel: tpu_custom_call.1
= control target key start
LH: loop header
LB: loop body
LE: loop exit
PB: predicated region body
PF: predicated region fallthrough
CT: control target
= control target key end

     0   :  { %10 = vsyncpa [#allocation3], 0  ;;  %s398_s0 = inlined_call_operand.hbm [shape: f32[8,256], index: 0, kind: input, shape index: {}]   ;;  %s399_s1 = inlined_call_operand.hbm [shape: f32[8,256], index: 1, kind: input, shape index: {}]   ;;  %s400_s2 = inlined_call_operand.hbm [shape: f32[1,8,128], index: 2, kind: output, shape index: {0}]   ;;  %s401_s3 = inlined_call_operand.hbm [shape: f32[1,8,128], index: 3, kind: output, shape index: {1}]   ;;  %s402_s4 = inlined_call_operand.hbm [shape: f32[1,8,128], index: 4, kind: output, shape index: {2}]  }
   0x1   :  { %11 = vsyncpa [#allocation6], 0 }
   0x2   :  { %12 = vsyncpa [#allocation4], 0 }
   0x3   :  { %13 = vsyncpa [#allocation9], 0  ;;  %s308_s15 = smov [#allocation2]   ;;  %s309_s17 = smov [#allocation5]  }
   0x4   :  { %s24_s16 = sshll.u32 %s308_s15, 4  ;;  %s38_s18 = sshll.u32 %s309_s17, 4  ;;  %s25_s16 = int_to_ptr.vmem [resolvable:$true] %s24_s16  ;;  %s39_s18 = int_to_ptr.vmem [resolvable:$true] %s38_s18 }
   0x5   :  { %s190_s21 = scalar_lea.hbm %s398_s0, 256 }
   0x6   :  { %p191_p0 = scmp.ne.s32.totalorder %s398_s0, %s190_s21  ;;  %p194_p1 = scmp.lt.u32.totalorder %s190_s21, %s398_s0 }
   0x8   :  { %p196_p2 = pnand %p194_p1, %p191_p0 }
   0xa   :  { %199 = shalt.err (!%p196_p2)
}
   0xb   :  { %s200_s26 = scalar_lea.vmem %s25_s16, 256  ;;  %p205_p4 = scmp.lt.s32.totalorder %s25_s16, %s25_s16 }
   0xc   :  { %p201_p3 = scmp.ne.s32.totalorder %s25_s16, %s200_s26  ;;  %p206_p5 = scmp.lt.s32.totalorder %s200_s26, %s200_s26 }
   0xe   :  { %p207_p6 = por %p206_p5, %p205_p4 }
  0x10   :  { %p208_p7 = pnand %p207_p6, %p201_p3 }
  0x12   :  { %211 = shalt.err (!%p208_p7)
}
  0x13   :  { %27 = dma.hbm_to_vmem [thread:$0]  %s398_s0, 256, %s25_s16, [#allocation3]  }
  0x14   :  { %s212_s5 = scalar_lea.hbm %s399_s1, 256 }
  0x15   :  { %p213_p8 = scmp.ne.s32.totalorder %s399_s1, %s212_s5  ;;  %p216_p9 = scmp.lt.u32.totalorder %s212_s5, %s399_s1 }
  0x17   :  { %p218_p10 = pnand %p216_p9, %p213_p8 }
  0x19   :  { %221 = shalt.err (!%p218_p10)
}
  0x1a   :  { %s222_s10 = scalar_lea.vmem %s39_s18, 256  ;;  %p227_p12 = scmp.lt.s32.totalorder %s39_s18, %s39_s18 }
  0x1b   :  { %p223_p11 = scmp.ne.s32.totalorder %s39_s18, %s222_s10  ;;  %p228_p13 = scmp.lt.s32.totalorder %s222_s10, %s222_s10 }
  0x1d   :  { %p229_p0 = por %p228_p13, %p227_p12 }
  0x1f   :  { %p230_p1 = pnand %p229_p0, %p223_p11 }
  0x21   :  { %233 = shalt.err (!%p230_p1)
}
  0x22   :  { %41 = dma.hbm_to_vmem [thread:$0]  %s399_s1, 256, %s39_s18, [#allocation6]  }
  0x23   :  { %300 = dma.done.wait [#allocation3], 256  }
  0x24   :  { %301 = vsyncadd [#allocation3], 4294967040 }
  0x25   :  { %302 = dma.done.wait [#allocation6], 256  }
  0x26   :  { %303 = vsyncadd [#allocation6], 4294967040  ;;  %v59_v0 = vld [vmem:[#allocation2] sm:$0xff]  ;;  %v60_v1 = vld [vmem:[#allocation2 + $0x8] sm:$0xff]  ;;  %s310_s1 = smov [#allocation7]   ;;  %s311_s13 = smov [#allocation8]  }
  0x27   :  { %v63_v2 = vand.u32 2147483647, %v59_v0  ;;  %v64_v3 = vand.u32 2147483647, %v60_v1  ;;  %v61_v14 = vld [vmem:[#allocation5] sm:$0xff]  ;;  %v62_v15 = vld [vmem:[#allocation5 + $0x8] sm:$0xff] }
  0x28   :  { %v71_v17 = vmax.f32 %v59_v0, 0.0  ;;  %v73_v18 = vmul.f32 %v61_v14, %v59_v0  ;;  %v72_v21 = vmax.f32 %v60_v1, 0.0  ;;  %v74_v22 = vmul.f32 %v62_v15, %v60_v1  ;;  %s135_s12 = sshll.u32 %s310_s1, 4  ;;  %s145_s14 = sshll.u32 %s311_s13, 4  ;;  %s136_s12 = int_to_ptr.vmem [resolvable:$true] %s135_s12  ;;  %s146_s14 = int_to_ptr.vmem [resolvable:$true] %s145_s14 }
  0x29   :  { %v65_v4 = vsub.f32 0.0, %v63_v2  ;;  %v66_v5 = vsub.f32 0.0, %v64_v3  ;;  %vm107_vm2 = vcmp.ge.f32.partialorder %v59_v0, 0.0  ;;  %vm108_vm3 = vcmp.ge.f32.partialorder %v60_v1, 0.0  ;;  %s312_s15 = smov [#allocation10]   ;;  %s234_s17 = scalar_lea.vmem %s136_s12, 128 }
  0x2a   :  { %v75_v30 = vsub.f32 %v71_v17, %v73_v18  ;;  %v76_v34 = vsub.f32 %v72_v21, %v74_v22  ;;  %s155_s16 = sshll.u32 %s312_s15, 4  ;;  %p235_p2 = scmp.ne.s32.totalorder %s136_s12, %s234_s17  ;;  %s156_s16 = int_to_ptr.vmem [resolvable:$true] %s155_s16 }
  0x2b   :  { %v67_v6 = vmul.f32 1.442695, %v65_v4  ;;  %v69_v7 = vmul.f32 1.442695, %v66_v5  ;;  %p239_p3 = scmp.lt.s32.totalorder %s136_s12, %s136_s12  ;;  %p240_p4 = scmp.lt.s32.totalorder %s234_s17, %s234_s17 }
  0x2d   :  { %178 = vpow2.f32 %v67_v6  ;;  %p241_p5 = por %p240_p4, %p239_p3 }
  0x2e   :  { %180 = vpow2.f32 %v69_v7 }
  0x2f   :  { %p242_p6 = pnand %p241_p5, %p235_p2 }
  0x37   :  { %v179_v8 = vpop.eup %178 }
  0x38   :  { %v181_v9 = vpop.eup %180  ;;  %v77_v10 = vadd.f32 1.0, %v179_v8  ;;  %v80_v12 = vmul.f32 -0.5, %v179_v8  ;;  %v83_v19 = vand.u32 2147483647, %v179_v8 }
  0x39   :  { %v86_v11 = vadd.f32 1.0, %v181_v9  ;;  %v89_v13 = vmul.f32 -0.5, %v181_v9  ;;  %v92_v23 = vand.u32 2147483647, %v181_v9 }
  0x3a   :  { %182 = vrcp.f32 %v77_v10  ;;  %v81_v16 = vadd.f32 1.0, %v80_v12  ;;  %vm84_vm0 = vcmp.lt.f32.partialorder %v83_v19, 0.0004427343 }
  0x3b   :  { %184 = vrcp.f32 %v86_v11  ;;  %v90_v20 = vadd.f32 1.0, %v89_v13  ;;  %vm93_vm1 = vcmp.lt.f32.partialorder %v92_v23, 0.0004427343 }
  0x3c   :  { %186 = vlog2.f32 %v77_v10  ;;  %v82_v27 = vmul.f32 %v179_v8, %v81_v16 }
  0x3d   :  { %188 = vlog2.f32 %v86_v11  ;;  %v91_v31 = vmul.f32 %v181_v9, %v90_v20 }
  0x44   :  { %v183_v24 = vpop.eup %182 }
  0x45   :  { %v185_v25 = vpop.eup %184  ;;  %v101_v26 = vmul.f32 %v183_v24, %v77_v10 }
  0x46   :  { %v187_v28 = vpop.eup %186  ;;  %v102_v29 = vmul.f32 %v185_v25, %v86_v11 }
  0x47   :  { %v189_v32 = vpop.eup %188  ;;  %v103_v33 = vsub.f32 2.0, %v101_v26  ;;  %v79_v35 = vmul.f32 0.6931472, %v187_v28 }
  0x48   :  { %v104_v36 = vsub.f32 2.0, %v102_v29  ;;  %v88_v37 = vmul.f32 0.6931472, %v189_v32 }
  0x49   :  { %v105_v38 = vmul.f32 %v183_v24, %v103_v33  ;;  %v85_v39 = vsel %vm84_vm0, %v82_v27, %v79_v35 }
  0x4a   :  { %v106_v40 = vmul.f32 %v185_v25, %v104_v36  ;;  %v94_v41 = vsel %vm93_vm1, %v91_v31, %v88_v37  ;;  %v95_v42 = vadd.f32 %v85_v39, %v75_v30 }
  0x4b   :  { %v109_v43 = vmul.f32 %v179_v8, %v105_v38  ;;  %v96_v44 = vadd.f32 %v94_v41, %v76_v34 }
  0x4c   :  { %v110_v45 = vmul.f32 %v181_v9, %v106_v40 }
  0x4d   :  { %v111_v46 = vsel %vm107_vm2, %v105_v38, %v109_v43  ;;  %v117_v47 = vadd.f32 %v96_v44, %v95_v42 }
  0x4e   :  { %v112_v48 = vsel %vm108_vm3, %v106_v40, %v110_v45  ;;  %v113_v49 = vmul.f32 %v111_v46, %v61_v14  ;;  %v115_v50 = vadd.f32 %v111_v46, %v61_v14 }
  0x4f   :  { %v114_v51 = vmul.f32 %v112_v48, %v62_v15  ;;  %v116_v52 = vadd.f32 %v112_v48, %v62_v15  ;;  %122 = vst [vmem:[#allocation7] sm:$0xff] %v117_v47 }
  0x51   :  { %v118_v53 = vadd.f32 %v114_v51, %v113_v49  ;;  %v119_v54 = vadd.f32 %v116_v52, %v115_v50 }
  0x52   :  { %245 = shalt.err (!%p242_p6)
}
  0x53   :  { %s246_s20 = scalar_lea.hbm %s400_s2, 128 }
  0x54   :  { %p247_p7 = scmp.ne.s32.totalorder %s400_s2, %s246_s20  ;;  %p250_p8 = scmp.lt.u32.totalorder %s246_s20, %s400_s2 }
  0x56   :  { %p252_p9 = pnand %p250_p8, %p247_p7 }
  0x58   :  { %255 = shalt.err (!%p252_p9)
}
  0x59   :  { %138 = dma.vmem_to_hbm [thread:$0]  %s136_s12, 128, %s400_s2, [#allocation4]   ;;  %125 = vst [vmem:[#allocation8] sm:$0xff] %v118_v53  ;;  %128 = vst [vmem:[#allocation10] sm:$0xff] %v119_v54 }
  0x5a   :  { %s256_s27 = scalar_lea.vmem %s146_s14, 128  ;;  %p261_p11 = scmp.lt.s32.totalorder %s146_s14, %s146_s14 }
  0x5b   :  { %p257_p10 = scmp.ne.s32.totalorder %s146_s14, %s256_s27  ;;  %p262_p12 = scmp.lt.s32.totalorder %s256_s27, %s256_s27 }
  0x5d   :  { %p263_p13 = por %p262_p12, %p261_p11 }
  0x5f   :  { %p264_p0 = pnand %p263_p13, %p257_p10 }
  0x61   :  { %267 = shalt.err (!%p264_p0)
}
  0x62   :  { %s268_s30 = scalar_lea.hbm %s401_s3, 128 }
  0x63   :  { %p269_p1 = scmp.ne.s32.totalorder %s401_s3, %s268_s30  ;;  %p272_p2 = scmp.lt.u32.totalorder %s268_s30, %s401_s3 }
  0x65   :  { %p274_p3 = pnand %p272_p2, %p269_p1 }
  0x67   :  { %277 = shalt.err (!%p274_p3)
}
  0x68   :  { %148 = dma.vmem_to_hbm [thread:$0]  %s146_s14, 128, %s401_s3, [#allocation9]  }
  0x69   :  { %s278_s10 = scalar_lea.vmem %s156_s16, 128  ;;  %p283_p5 = scmp.lt.s32.totalorder %s156_s16, %s156_s16 }
  0x6a   :  { %p279_p4 = scmp.ne.s32.totalorder %s156_s16, %s278_s10  ;;  %p284_p6 = scmp.lt.s32.totalorder %s278_s10, %s278_s10 }
  0x6c   :  { %p285_p7 = por %p284_p6, %p283_p5 }
  0x6e   :  { %p286_p8 = pnand %p285_p7, %p279_p4 }
  0x70   :  { %289 = shalt.err (!%p286_p8)
}
  0x71   :  { %s290_s1 = scalar_lea.hbm %s402_s4, 128 }
  0x72   :  { %p291_p9 = scmp.ne.s32.totalorder %s402_s4, %s290_s1  ;;  %p294_p10 = scmp.lt.u32.totalorder %s290_s1, %s402_s4 }
  0x74   :  { %p296_p11 = pnand %p294_p10, %p291_p9 }
  0x76   :  { %299 = shalt.err (!%p296_p11)
}
  0x77   :  { %158 = dma.vmem_to_hbm [thread:$0]  %s156_s16, 128, %s402_s4, [#allocation9]  }
  0x78   :  { %304 = dma.done.wait [#allocation4], 128  }
  0x79   :  { %305 = vsyncadd [#allocation4], 4294967168 }
  0x7a   :  { %306 = dma.done.wait [#allocation9], 256  }
  0x7b   :  { %307 = vsyncadd [#allocation9], 4294967040 }
  0x7c   :  { %168 = vsyncpa [#allocation3], 1 }
  0x7d   :  { %169 = vsyncpa [#allocation6], 1 }
  0x7e   :  { %170 = vsyncpa [#allocation4], 1 }
  0x7f   :  { %171 = vsyncpa [#allocation9], 1 }

</bundles_post_ra>
